<compile_context>
chip_gen: v5e
topology: v5e:2x2
jax: 0.10.0
libtpu: 0.0.40
codegen_flags: <defaults>
</compile_context>

<pallas_src>
import math

import jax
import jax.numpy as jnp
from jax.experimental import pallas as pl
from jax.experimental.pallas import tpu as pltpu


def _make_mlp_kernel(num_layers):
    """Build a fused kernel for an `num_layers`-deep [Linear -> ReLU] stack.

    Ref order: x_ref, w_t_ref * num_layers, b_ref * num_layers, o_ref.
    The Python for-loop unrolls statically, letting the scheduler overlap each
    matmul's MXU push/pop with the previous layer's bias/ReLU VPU work.
    """

    def kernel(x_ref, *refs):
        w_refs = refs[:num_layers]
        b_refs = refs[num_layers:2 * num_layers]
        o_ref = refs[2 * num_layers]

        h = x_ref[...]
        for l in range(num_layers):
            y = jnp.dot(h, w_refs[l][...], preferred_element_type=jnp.float32)
            y = y + b_refs[l][...]          # (1, out) broadcasts over batch
            h = jnp.maximum(y, 0.0)         # ReLU after every layer (incl. last)
        o_ref[...] = h.astype(o_ref.dtype)

    return kernel


def mlp_forward(x, weights_t, biases, *, batch_tile=None):
    """Fused relu(L_n(...relu(L_1(x))...)) in a single pallas_call.

    weights_t: list of (in, out) arrays (already transposed from PyTorch layout)
    biases:    list of (1, out) arrays
    batch_tile: optional row-tile size (multiple of 8) for large batches.
    """
    num_layers = len(weights_t)
    B, _ = x.shape
    out_features = weights_t[-1].shape[1]
    kernel = _make_mlp_kernel(num_layers)
    out_shape = jax.ShapeDtypeStruct((B, out_features), x.dtype)

    if batch_tile is None or batch_tile >= B:
        # Everything fits comfortably in VMEM: no grid, whole-array VMEM blocks,
        # activations live entirely in vregs/VMEM.
        vmem_spec = pl.BlockSpec(memory_space=pltpu.MemorySpace.VMEM)
        return pl.pallas_call(
            kernel,
            out_shape=out_shape,
            in_specs=[vmem_spec] * (1 + 2 * num_layers),
            out_specs=vmem_spec,
        )(x, *weights_t, *biases)

    # Large-batch path: tile ONLY the batch axis. Weights/biases use a constant
    # index_map (same block every step) so they are loaded once and stay
    # VMEM-resident; features stay lane-dense (full last dim).
    grid = (pl.cdiv(B, batch_tile),)
    x_spec = pl.BlockSpec((batch_tile, x.shape[1]), lambda i: (i, 0))
    w_specs = [pl.BlockSpec(w.shape, lambda i: (0, 0)) for w in weights_t]
    b_specs = [pl.BlockSpec(b.shape, lambda i: (0, 0)) for b in biases]
    o_spec = pl.BlockSpec((batch_tile, out_features), lambda i: (i, 0))
    return pl.pallas_call(
        kernel,
        out_shape=out_shape,
        grid=grid,
        in_specs=[x_spec] + w_specs + b_specs,
        out_specs=o_spec,
        compiler_params=pltpu.CompilerParams(
            dimension_semantics=("parallel",)  # shards batch tiles across TCs
        ),
    )(x, *weights_t, *biases)


class SimpleNeuralNetBodyPallas:
    """JAX/Pallas port of SimpleNeuralNetBody.

    forward(x) = relu(L_n(... relu(L_1(x)) ...)) where L_i is nn.Linear.
    Matches the PyTorch module: the activation (ReLU) is applied after EVERY
    layer, including the last one.

    Parameters are initialized with PyTorch's default Linear init
    (uniform(-1/sqrt(fan_in), 1/sqrt(fan_in))) using a fixed JAX PRNG key.
    Weights are stored pre-transposed as (in_features, out_features).
    """

    def __init__(self, state_size, hidden_layers_sizes=(10,), seed=42):
        self.layers_sizes = (state_size,) + tuple(hidden_layers_sizes)
        key = jax.random.PRNGKey(seed)
        self.weights_t = []   # (in, out), contiguous, transposed once at init
        self.biases = []      # (1, out)
        for fan_in, fan_out in zip(self.layers_sizes[:-1], self.layers_sizes[1:]):
            key, kw, kb = jax.random.split(key, 3)
            bound = 1.0 / math.sqrt(fan_in)
            w = jax.random.uniform(
                kw, (fan_out, fan_in), jnp.float32, minval=-bound, maxval=bound
            )
            b = jax.random.uniform(
                kb, (1, fan_out), jnp.float32, minval=-bound, maxval=bound
            )
            self.weights_t.append(jnp.asarray(jnp.transpose(w)))  # (in, out)
            self.biases.append(b)

    def forward(self, x, *, batch_tile=None):
        return mlp_forward(x, self.weights_t, self.biases, batch_tile=batch_tile)

    __call__ = forward


if __name__ == "__main__":
    batch = 8
    state_size = 32
    hidden_layers_sizes = (64, 32)

    model = SimpleNeuralNetBodyPallas(state_size, hidden_layers_sizes, seed=42)

    key = jax.random.PRNGKey(0)
    x = jax.random.normal(key, (batch, state_size), dtype=jnp.float32)

    out = model(x)
    out = jax.block_until_ready(out)

    # Pure-JAX reference check (same math: relu(x @ W_t + b) per layer).
    ref = x
    for w_t, b in zip(model.weights_t, model.biases):
        ref = jnp.maximum(ref @ w_t + b, 0.0)

    assert out.shape == (batch, hidden_layers_sizes[-1])
    assert jnp.allclose(out, ref, atol=1e-5, rtol=1e-5)

    print("KERNEL_OK")
</pallas_src>

<mosaic_0001>
module attributes {stable_mosaic.version = 11 : i64} {
  func.func @kernel(%arg0: memref<8x32xf32, #tpu.memory_space<vmem>>, %arg1: memref<32x64xf32, #tpu.memory_space<vmem>>, %arg2: memref<64x32xf32, #tpu.memory_space<vmem>>, %arg3: memref<1x64xf32, #tpu.memory_space<vmem>>, %arg4: memref<1x32xf32, #tpu.memory_space<vmem>>, %arg5: memref<8x32xf32, #tpu.memory_space<vmem>>) attributes {dimension_semantics = [], scalar_prefetch = 0 : i64, scratch_operands = 0 : i64, tpu.core_type = #tpu.core_type<tc>} {
    %c0 = arith.constant 0 : index
    %c0_0 = arith.constant 0 : index
    %0 = vector.load %arg0[%c0, %c0_0] : memref<8x32xf32, #tpu.memory_space<vmem>>, vector<8x32xf32>
    %c0_1 = arith.constant 0 : index
    %c0_2 = arith.constant 0 : index
    %1 = vector.load %arg1[%c0_1, %c0_2] : memref<32x64xf32, #tpu.memory_space<vmem>>, vector<32x64xf32>
    %cst = arith.constant dense<0.000000e+00> : vector<8x64xf32>
    %2 = tpu.matmul %0, %1, %cst {dimension_numbers = #tpu.dot_dimension_numbers<[1], [0], [0], [1], [0, 0, 1, 1], [], []>} : vector<8x32xf32>, vector<32x64xf32>, vector<8x64xf32> -> vector<8x64xf32>
    %c0_3 = arith.constant 0 : index
    %c0_4 = arith.constant 0 : index
    %3 = vector.load %arg3[%c0_3, %c0_4] : memref<1x64xf32, #tpu.memory_space<vmem>>, vector<1x64xf32>
    %4 = vector.broadcast %3 : vector<1x64xf32> to vector<8x64xf32>
    %5 = arith.addf %2, %4 : vector<8x64xf32>
    %cst_5 = arith.constant 0.000000e+00 : f32
    %6 = vector.broadcast %cst_5 : f32 to vector<8x64xf32>
    %7 = arith.maximumf %5, %6 : vector<8x64xf32>
    %c0_6 = arith.constant 0 : index
    %c0_7 = arith.constant 0 : index
    %8 = vector.load %arg2[%c0_6, %c0_7] : memref<64x32xf32, #tpu.memory_space<vmem>>, vector<64x32xf32>
    %cst_8 = arith.constant dense<0.000000e+00> : vector<8x32xf32>
    %9 = tpu.matmul %7, %8, %cst_8 {dimension_numbers = #tpu.dot_dimension_numbers<[1], [0], [0], [1], [0, 0, 1, 1], [], []>} : vector<8x64xf32>, vector<64x32xf32>, vector<8x32xf32> -> vector<8x32xf32>
    %c0_9 = arith.constant 0 : index
    %c0_10 = arith.constant 0 : index
    %10 = vector.load %arg4[%c0_9, %c0_10] : memref<1x32xf32, #tpu.memory_space<vmem>>, vector<1x32xf32>
    %11 = vector.broadcast %10 : vector<1x32xf32> to vector<8x32xf32>
    %12 = arith.addf %9, %11 : vector<8x32xf32>
    %cst_11 = arith.constant 0.000000e+00 : f32
    %13 = vector.broadcast %cst_11 : f32 to vector<8x32xf32>
    %14 = arith.maximumf %12, %13 : vector<8x32xf32>
    %c0_12 = arith.constant 0 : index
    %c0_13 = arith.constant 0 : index
    %15 = vector.load %arg5[%c0_12, %c0_13] : memref<8x32xf32, #tpu.memory_space<vmem>>, vector<8x32xf32>
    tpu.vector_store %arg5[%c0_12, %c0_13], %14 {strides = array<i32>} : memref<8x32xf32, #tpu.memory_space<vmem>>, vector<8x32xf32>,
    return
  }
}

</mosaic_0001>

<bundles_post_ra>
// kernel: tpu_custom_call.1
= control target key start
LH: loop header
LB: loop body
LE: loop exit
PB: predicated region body
PF: predicated region fallthrough
CT: control target
= control target key end

     0   :  { %s221_s0 = inlined_call_operand.vmem [shape: f32[8,32], index: 0, kind: input, shape index: {}]   ;;  %s222_s1 = inlined_call_operand.vmem [shape: f32[32,64], index: 1, kind: input, shape index: {}]   ;;  %s223_s2 = inlined_call_operand.vmem [shape: f32[64,32], index: 2, kind: input, shape index: {}]   ;;  %s224_s3 = inlined_call_operand.vmem [shape: f32[1,64], index: 3, kind: input, shape index: {}]   ;;  %s225_s4 = inlined_call_operand.vmem [shape: f32[1,32], index: 4, kind: input, shape index: {}]   ;;  %s226_s5 = inlined_call_operand.hbm [shape: f32[8,32], index: 5, kind: output, shape index: {}]  }
   0x1   :  { %v25_v0 = vld [vmem:[%s222_s1 + $0x18] sm:$0xff]  ;;  %v24_v1 = vld [vmem:[%s222_s1 + $0x10] sm:$0xff]  ;;  %v23_v3 = vld [vmem:[%s222_s1 + $0x8] sm:$0xff] }
   0x2   :  { %46 = vmatpush.msra.mxu0 %v25_v0  ;;  %v62_v2 = vld [vmem:[%s223_s2 + $0x38] sm:$0xff]  ;;  %v61_v4 = vld [vmem:[%s223_s2 + $0x30] sm:$0xff]  ;;  %v60_v5 = vld [vmem:[%s223_s2 + $0x28] sm:$0xff] }
   0x3   :  { %79 = vmatpush.msra.mxu1 %v62_v2  ;;  %v22_v6 = vld [vmem:[%s222_s1] sm:$0xff] }
   0x4   :  { %47 = vmatpush.msra.mxu0 %v24_v1 }
   0x5   :  { %80 = vmatpush.msra.mxu1 %v61_v4 }
   0x6   :  { %10 = vsyncpa [#allocation3], 0  ;;  %48 = vmatpush.msra.mxu0 %v23_v3  ;;  %v21_v7 = vld [vmem:[%s221_s0] sm:$0xff]  ;;  %vm30_vm0 = vcmask 261120   ;;  %v58_v9 = vld [vmem:[%s223_s2 + $0x18] sm:$0xff]  ;;  %vm67_vm1 = vcmask 523264  }
   0x7   :  { %v59_v8 = vld [vmem:[%s223_s2 + $0x20] sm:$0xff]  ;;  %81 = vmatpush.msra.mxu1 %v60_v5  ;;  %v57_v10 = vld [vmem:[%s223_s2 + $0x10] sm:$0xff]  ;;  %v56_v11 = vld [vmem:[%s223_s2 + $0x8] sm:$0xff]  ;;  %s140_s21 = smov [#allocation2]  }
   0x8   :  { %49 = vmatpush.msra.mxu0 %v22_v6  ;;  %v55_v12 = vld [vmem:[%s223_s2] sm:$0xff]  ;;  %s98_s22 = sshll.u32 %s140_s21, 4  ;;  %s100_s2 = sshll.u32 %s226_s5, 4  ;;  %s99_s22 = int_to_ptr.vmem [resolvable:$true] %s98_s22  ;;  %s101_s2 = int_to_ptr.hbm [resolvable:$true] %s100_s2 }
   0x9   :  { %109 = vmatmul.msk.f32.vlgmr.msra.gmra.mxu0 %vm30_vm0, %v21_v7  ;;  %82 = vmatpush.msra.mxu1 %v59_v8  ;;  %v112_v13 = vld [vmem:[%s224_s3] ss:$0 sm:$0xff] }
   0xa   :  { %v113_v17 = vld [vmem:[%s225_s4] ss:$0 sm:$0xff] }
   0xb   :  { %83 = vmatpush.msra.mxu1 %v58_v9 }
   0xd   :  { %84 = vmatpush.msra.mxu1 %v57_v10 }
   0xf   :  { %85 = vmatpush.msra.mxu1 %v56_v11 }
  0x11   :  { %86 = vmatpush.msra.mxu1 %v55_v12 }
  0x86   :  { %v51_v14 = vpop.f32.mrf.mxu0 }
  0x87   :  { %v52_v15 = vadd.f32 %v112_v13, %v51_v14 }
  0x89   :  { %v54_v16 = vmax.f32 %v52_v15, 0.0 }
  0x8b   :  { %110 = vmatmul.msk.f32.vlgmr.msra.gmra.mxu1 %vm67_vm1, %v54_v16 }
 0x108   :  { %v88_v18 = vpop.f32.mrf.mxu1 }
 0x109   :  { %v89_v19 = vadd.f32 %v113_v17, %v88_v18 }
 0x10b   :  { %v91_v20 = vmax.f32 %v89_v19, 0.0 }
 0x10d   :  { %92 = vst.msk [vmem:[#allocation2] sm:$0xff] %vm30_vm0, %v91_v20 }
 0x10e   :  { %103 = dma.vmem_to_hbm [thread:$0]  %s99_s22, 128, %s101_s2, [#allocation3]  }
 0x10f   :  { %138 = dma.done.wait [#allocation3], 128  }
 0x110   :  { %139 = vsyncadd [#allocation3], 4294967168 }
 0x111   :  { %108 = vsyncpa [#allocation3], 1 }

</bundles_post_ra>
